<compile_context>
chip_gen: v7x
topology: tpu7x:2x2x1
jax: 0.10.0
libtpu: 0.0.40
codegen_flags: <defaults>
</compile_context>

<pallas_src>
import functools

import jax
import jax.numpy as jnp
from jax.experimental import pallas as pl
from jax.experimental.pallas import tpu as pltpu

_LANE = 128      # vreg lane width
_SUBLANE = 8     # f32 sublane count
_TM_MAX = 512    # max lane-tile (multiple of 128)

_KSP = {2: (6, 2, 2), 4: (8, 4, 2), 8: (12, 8, 2)}


def _round_up(x, m):
    return (x + m - 1) // m * m


# ----------------------------- Pallas kernels ------------------------------

def _wx_bias_prelu_kernel(w_ref, x_ref, b_ref, a_ref, o_ref):
    # w: (Cp, Kp) bf16, x: (Kp, TM) bf16, b/a: (Cp, 1) f32 -> o: (Cp, TM)
    z = jnp.dot(w_ref[...], x_ref[...], preferred_element_type=jnp.float32)
    z = z + b_ref[...]
    o_ref[...] = jnp.where(z >= 0.0, z, a_ref[...] * z).astype(o_ref.dtype)


def _wx_bias_prelu_res_kernel(add_residual, w_ref, x_ref, b_ref, a_ref,
                              r_ref, o_ref):
    # Fused: PReLU(w @ x + b) +/- r; sign resolved at trace time; epilogue f32.
    z = jnp.dot(w_ref[...], x_ref[...], preferred_element_type=jnp.float32)
    z = z + b_ref[...]
    pz = jnp.where(z >= 0.0, z, a_ref[...] * z)
    r = r_ref[...].astype(jnp.float32)
    o_ref[...] = (pz + r if add_residual else pz - r).astype(o_ref.dtype)


def fused_wx_bias_prelu(w, x_t, b, a, residual=None, add_residual=True,
                        out_dtype=jnp.bfloat16):
    """out = PReLU(w @ x_t + b) (+/- residual), transposed (channel, M) layout.

    w        : (cout, K) f32   -- conv weights, channel-major rows
    x_t      : (K, M)    bf16  -- K-major / M-lane patch matrix
    b, a     : (cout,)   f32   -- bias / PReLU alpha
    residual : (cout, M) bf16  -- optional fused residual (added in f32)

    Output channels live on sublanes (pad cout -> multiple of 8), M on lanes
    (tile multiple of 128) -> lane-dense unmasked stores.  Weights / bias /
    alpha are pinned in VMEM across the M-tile grid (index_map -> (0, 0)).
    """
    cout, K = w.shape
    K2, M = x_t.shape
    assert K2 == K
    Cp = _round_up(cout, _SUBLANE)
    Kp = _round_up(K, 16)                 # bf16 sublane packing of the RHS
    Mp = _round_up(M, _LANE)
    if Mp >= 2 * _LANE:                   # >=2 grid steps when M allows (v7x)
        TM = min(_TM_MAX, _round_up(Mp // 2, _LANE))
    else:
        TM = Mp
    Mp = _round_up(Mp, TM)
    grid = (Mp // TM,)

    wp = jnp.pad(w.astype(jnp.bfloat16), ((0, Cp - cout), (0, Kp - K)))
    xp = x_t.astype(jnp.bfloat16)
    if Kp != K or Mp != M:
        xp = jnp.pad(xp, ((0, Kp - K), (0, Mp - M)))
    bp = jnp.pad(b.astype(jnp.float32).reshape(cout, 1),
                 ((0, Cp - cout), (0, 0)))
    ap = jnp.pad(a.astype(jnp.float32).reshape(cout, 1),
                 ((0, Cp - cout), (0, 0)))

    w_spec = pl.BlockSpec((Cp, Kp), lambda i: (0, 0))   # pinned in VMEM
    x_spec = pl.BlockSpec((Kp, TM), lambda i: (0, i))
    v_spec = pl.BlockSpec((Cp, 1), lambda i: (0, 0))    # pinned in VMEM
    o_spec = pl.BlockSpec((Cp, TM), lambda i: (0, i))

    # Cost estimate from the true GEMM shape (not the padded one).
    out_bytes = jnp.dtype(out_dtype).itemsize
    flops = 2 * cout * K * M
    bytes_accessed = (K * M * 2 + cout * K * 2 + 2 * cout * 4
                      + cout * M * out_bytes)

    if residual is None:
        kernel = _wx_bias_prelu_kernel
        in_specs = [w_spec, x_spec, v_spec, v_spec]
        args = (wp, xp, bp, ap)
    else:
        kernel = functools.partial(_wx_bias_prelu_res_kernel,
                                   bool(add_residual))
        rp = residual.astype(jnp.bfloat16)
        if rp.shape != (Cp, Mp):
            rp = jnp.pad(rp, ((0, Cp - cout), (0, Mp - M)))
        in_specs = [w_spec, x_spec, v_spec, v_spec, o_spec]
        args = (wp, xp, bp, ap, rp)
        bytes_accessed += cout * M * 2

    out = pl.pallas_call(
        kernel,
        out_shape=jax.ShapeDtypeStruct((Cp, Mp), out_dtype),
        grid=grid,
        in_specs=in_specs,
        out_specs=o_spec,
        compiler_params=pltpu.CompilerParams(
            dimension_semantics=("parallel",)),
        cost_estimate=pl.CostEstimate(
            flops=flops, transcendentals=0, bytes_accessed=bytes_accessed),
    )(*args)
    return out[:cout, :M]


# ------------------------------- JAX glue ----------------------------------

def im2col_t(x_cnhw, k, stride, pad):
    """K-major / M-lane patch matrix: (k*k*C, N*OH*OW), tap-major/chan-minor."""
    C, N, H, W = x_cnhw.shape
    xp = jnp.pad(x_cnhw, ((0, 0), (0, 0), (pad, pad), (pad, pad)))
    OH = (H + 2 * pad - k) // stride + 1
    OW = (W + 2 * pad - k) // stride + 1
    taps = []
    for i in range(k):
        for j in range(k):
            taps.append(xp[:, :, i:i + stride * OH:stride,
                           j:j + stride * OW:stride])   # (C, N, OH, OW)
    patches = jnp.stack(taps, axis=0)                   # (k*k, C, N, OH, OW)
    return patches.reshape(k * k * C, N * OH * OW), (N, OH, OW)


def conv2d_prelu(x_cnhw, w_oihw, b, alpha, k, stride, pad,
                 residual_cnhw=None, add_residual=True,
                 out_dtype=jnp.bfloat16):
    """Conv2d (OIHW weights) + bias + per-channel PReLU (+ fused residual)."""
    cout, cin = w_oihw.shape[0], w_oihw.shape[1]
    if k == 1 and stride == 1 and pad == 0:
        C, NN, H, W = x_cnhw.shape
        rows, (N, OH, OW) = x_cnhw.reshape(C, NN * H * W), (NN, H, W)
    else:
        rows, (N, OH, OW) = im2col_t(x_cnhw, k, stride, pad)
    # match im2col_t ordering: (cout, (i*k + j)*cin + ci)
    w_mat = jnp.transpose(w_oihw, (0, 2, 3, 1)).reshape(cout, k * k * cin)
    r = None if residual_cnhw is None else residual_cnhw.reshape(cout, -1)
    out = fused_wx_bias_prelu(w_mat, rows, b, alpha, residual=r,
                              add_residual=add_residual, out_dtype=out_dtype)
    return out.reshape(cout, N, OH, OW)


def deconv_prelu_subpixel(x_cnhw, w_iohw, b, alpha, k, s, p,
                          residual_cnhw, out_dtype=jnp.bfloat16):
    """PReLU(ConvTranspose2d(x)) - residual via the s^2 sub-pixel decomposition.

    Each output phase (a, b) is an ordinary (k/s x k/s) conv on the *undilated*
    input; the s^2 phases are folded into the output-channel (sublane) axis of
    one GEMM and pixel-shuffled back -- no inserted zeros reach the MXU.
    Requires k % s == 0 and p % s == 0 (true for scale_factor == 2).
    """
    cin, cout = w_iohw.shape[0], w_iohw.shape[1]   # ConvTranspose weight: IOHW
    ksub, d = k // s, p // s
    pad_sub = ksub - 1 - d
    rows, (N, Hq, Wq) = im2col_t(x_cnhw, ksub, 1, pad_sub)
    OH, OW = s * Hq, s * Wq

    # Per-phase sub-kernels, phases folded into the output-channel dim.
    blocks = []
    for a in range(s):
        ry = (a + p) % s
        for bb in range(s):
            rx = (bb + p) % s
            sub = w_iohw[:, :, ry::s, rx::s][:, :, ::-1, ::-1]  # (cin,cout,ks,ks)
            blocks.append(jnp.transpose(sub, (1, 2, 3, 0))
                          .reshape(cout, ksub * ksub * cin))
    w_big = jnp.concatenate(blocks, axis=0)      # (s*s*cout, ksub*ksub*cin)
    b_big = jnp.tile(b, s * s)
    a_big = jnp.tile(alpha, s * s)

    # Residual (full resolution) -> phase-folded (space-to-depth) layout.
    r = residual_cnhw.reshape(cout, N, Hq, s, Wq, s)
    r_big = jnp.transpose(r, (3, 5, 0, 1, 2, 4)).reshape(s * s * cout,
                                                         N * Hq * Wq)

    out_big = fused_wx_bias_prelu(w_big, rows, b_big, a_big, residual=r_big,
                                  add_residual=False, out_dtype=out_dtype)
    # Pixel-shuffle the phase-folded output back to (C, N, OH, OW).
    e = out_big.reshape(s, s, cout, N, Hq, Wq)
    return jnp.transpose(e, (2, 3, 4, 0, 5, 1)).reshape(cout, N, OH, OW)


def deconv_prelu_dilated(x_cnhw, w_iohw, b, alpha, k, s, p,
                         residual_cnhw, out_dtype=jnp.bfloat16):
    # TODO(synk): generalize the sub-pixel decomposition to k % s != 0 /
    # p % s != 0 (scale 4/8) so inserted zeros never reach the MXU here either.
    C, N, H, W = x_cnhw.shape
    z = jnp.zeros((C, N, (H - 1) * s + 1, (W - 1) * s + 1), x_cnhw.dtype)
    z = z.at[:, :, ::s, ::s].set(x_cnhw)
    w_eq = jnp.transpose(w_iohw, (1, 0, 2, 3))[:, :, ::-1, ::-1]   # OIHW, flip
    return conv2d_prelu(z, w_eq, b, alpha, k, 1, k - 1 - p,
                        residual_cnhw=residual_cnhw, add_residual=False,
                        out_dtype=out_dtype)


# ---------------------------- DownProjection -------------------------------

def down_projection_forward(x_nchw, params, scale_factor=2):
    # TODO(synk): fuse the bottleneck->Conv_1->Deconv->Conv_2 chain (weights,
    # activations and in-kernel patch extraction) into a single pallas_call
    # with VMEM-resident intermediates to remove the per-layer launch + HBM
    # round trips; at these shapes everything fits well inside v7x's 32 MiB
    # scoped VMEM.
    k, s, p = _KSP[scale_factor]
    x = jnp.transpose(x_nchw, (1, 0, 2, 3)).astype(jnp.bfloat16)  # (C, N, H, W)

    # BottleNeck: 1x1 conv + PReLU
    x = conv2d_prelu(x, params["bn_w"], params["bn_b"], params["bn_a"], 1, 1, 0)

    # L_0 = Conv_1(x)
    L0 = conv2d_prelu(x, params["c1_w"], params["c1_b"], params["c1_a"],
                      k, s, p)

    # e = PReLU(Deconv(L_0) + b) - x   (subtraction fused into the epilogue)
    if k % s == 0 and p % s == 0 and (k // s - 1 - p // s) >= 0:
        e = deconv_prelu_subpixel(L0, params["dc_w"], params["dc_b"],
                                  params["dc_a"], k, s, p, residual_cnhw=x)
    else:
        e = deconv_prelu_dilated(L0, params["dc_w"], params["dc_b"],
                                 params["dc_a"], k, s, p, residual_cnhw=x)

    # L = Conv_2(e) + L_0   (addition fused into the epilogue), f32 output
    L = conv2d_prelu(e, params["c2_w"], params["c2_b"], params["c2_a"],
                     k, s, p, residual_cnhw=L0, add_residual=True,
                     out_dtype=jnp.float32)

    return jnp.transpose(L, (1, 0, 2, 3))   # -> NCHW


# ---------------------------- pure-JAX reference ---------------------------
# Mirrors the kernel path's precision: bf16 MXU operands / f32 accumulation,
# f32 epilogue, bf16 intermediate activations, f32 final output.

def _ref_conv_prelu(x_nchw, w_oihw, b, a, stride, pad, lhs_dil=1):
    y = jax.lax.conv_general_dilated(
        x_nchw.astype(jnp.bfloat16), w_oihw.astype(jnp.bfloat16),
        (stride, stride), [(pad, pad), (pad, pad)],
        lhs_dilation=(lhs_dil, lhs_dil),
        dimension_numbers=("NCHW", "OIHW", "NCHW"),
        preferred_element_type=jnp.float32)
    y = y + b[None, :, None, None]
    return jnp.where(y >= 0, y, a[None, :, None, None] * y)


def down_projection_ref(x_nchw, params, scale_factor=2):
    k, s, p = _KSP[scale_factor]
    x = _ref_conv_prelu(x_nchw, params["bn_w"], params["bn_b"],
                        params["bn_a"], 1, 0).astype(jnp.bfloat16)
    L0 = _ref_conv_prelu(x, params["c1_w"], params["c1_b"], params["c1_a"],
                         s, p).astype(jnp.bfloat16)
    w_eq = jnp.transpose(params["dc_w"], (1, 0, 2, 3))[:, :, ::-1, ::-1]
    H0 = _ref_conv_prelu(L0, w_eq, params["dc_b"], params["dc_a"],
                         1, k - 1 - p, lhs_dil=s)
    e = (H0 - x.astype(jnp.float32)).astype(jnp.bfloat16)
    L1 = _ref_conv_prelu(e, params["c2_w"], params["c2_b"], params["c2_a"],
                         s, p)
    return L1 + L0.astype(jnp.float32)


# --------------------------------- main -------------------------------------

if __name__ == "__main__":
    scale_factor = 2
    in_channels, out_channels = 4, 4
    mid_channels = out_channels  # bottleneck=True
    k, s, p = _KSP[scale_factor]
    N, H, W = 2, 16, 16

    key = jax.random.PRNGKey(0)
    keys = jax.random.split(key, 9)

    params = {
        # BottleNeck: Conv2d(in_channels, out_channels, 1) + PReLU(out_channels)
        "bn_w": jax.random.normal(keys[0], (out_channels, in_channels, 1, 1), jnp.float32) * 0.05,
        "bn_b": jax.random.normal(keys[1], (out_channels,), jnp.float32) * 0.01,
        "bn_a": jnp.full((out_channels,), 0.25, jnp.float32),
        # Conv_1: Conv2d(mid, out, k, s, p) + PReLU(out)
        "c1_w": jax.random.normal(keys[2], (out_channels, mid_channels, k, k), jnp.float32) * 0.05,
        "c1_b": jax.random.normal(keys[3], (out_channels,), jnp.float32) * 0.01,
        "c1_a": jnp.full((out_channels,), 0.25, jnp.float32),
        # Deconv: ConvTranspose2d(out, mid, k, s, p) + PReLU(mid); weight IOHW
        "dc_w": jax.random.normal(keys[4], (out_channels, mid_channels, k, k), jnp.float32) * 0.05,
        "dc_b": jax.random.normal(keys[5], (mid_channels,), jnp.float32) * 0.01,
        "dc_a": jnp.full((mid_channels,), 0.25, jnp.float32),
        # Conv_2: Conv2d(mid, out, k, s, p) + PReLU(out)
        "c2_w": jax.random.normal(keys[6], (out_channels, mid_channels, k, k), jnp.float32) * 0.05,
        "c2_b": jax.random.normal(keys[7], (out_channels,), jnp.float32) * 0.01,
        "c2_a": jnp.full((out_channels,), 0.25, jnp.float32),
    }

    x = jax.random.normal(keys[8], (N, in_channels, H, W), jnp.float32)

    fwd = jax.jit(functools.partial(down_projection_forward,
                                    scale_factor=scale_factor))
    out = fwd(x, params)
    out = jax.block_until_ready(out)

    ref = down_projection_ref(x, params, scale_factor=scale_factor)
    assert out.shape == (N, out_channels, H // s, W // s), out.shape
    # Both paths use the same bf16 operands / bf16 intermediates with f32
    # accumulation; remaining skew is accumulation order + rare 1-ulp rounding
    # coincidences of the bf16 intermediates.
    assert jnp.allclose(out, ref, atol=5e-3, rtol=5e-3), \
        float(jnp.max(jnp.abs(out - ref)))

    print("KERNEL_OK")
</pallas_src>

<mosaic_0001>
module attributes {stable_mosaic.version = 11 : i64} {
  func.func @_wx_bias_prelu_kernel(%arg0: i32, %arg1: memref<8x16xbf16, #tpu.memory_space<vmem>>, %arg2: memref<16x256xbf16, #tpu.memory_space<vmem>>, %arg3: memref<8x1xf32, #tpu.memory_space<vmem>>, %arg4: memref<8x1xf32, #tpu.memory_space<vmem>>, %arg5: memref<8x256xbf16, #tpu.memory_space<vmem>>) attributes {dimension_semantics = [#tpu.dimension_semantics<parallel>], iteration_bounds = array<i64: 2>, scalar_prefetch = 0 : i64, scratch_operands = 0 : i64, tpu.core_type = #tpu.core_type<tc>, window_params = [{pipeline_mode = #tpu.pipeline_mode<synchronous>, transform_indices = @transform_0, window_bounds = array<i64: 8, 16>}, {transform_indices = @transform_1, window_bounds = array<i64: 16, 256>}, {pipeline_mode = #tpu.pipeline_mode<synchronous>, transform_indices = @transform_2, window_bounds = array<i64: 8, 1>}, {pipeline_mode = #tpu.pipeline_mode<synchronous>, transform_indices = @transform_3, window_bounds = array<i64: 8, 1>}, {transform_indices = @transform_4, window_bounds = array<i64: 8, 256>}]} {
    %c0 = arith.constant 0 : index
    %c0_0 = arith.constant 0 : index
    %0 = vector.load %arg1[%c0, %c0_0] : memref<8x16xbf16, #tpu.memory_space<vmem>>, vector<8x16xbf16>
    %c0_1 = arith.constant 0 : index
    %c0_2 = arith.constant 0 : index
    %1 = vector.load %arg2[%c0_1, %c0_2] : memref<16x256xbf16, #tpu.memory_space<vmem>>, vector<16x256xbf16>
    %cst = arith.constant dense<0.000000e+00> : vector<8x256xf32>
    %2 = tpu.matmul %0, %1, %cst {dimension_numbers = #tpu.dot_dimension_numbers<[1], [0], [0], [1], [0, 0, 1, 1], [], []>} : vector<8x16xbf16>, vector<16x256xbf16>, vector<8x256xf32> -> vector<8x256xf32>
    %c0_3 = arith.constant 0 : index
    %c0_4 = arith.constant 0 : index
    %3 = vector.load %arg3[%c0_3, %c0_4] : memref<8x1xf32, #tpu.memory_space<vmem>>, vector<8x1xf32>
    %4 = vector.broadcast %3 : vector<8x1xf32> to vector<8x256xf32>
    %5 = arith.addf %2, %4 : vector<8x256xf32>
    %cst_5 = arith.constant 0.000000e+00 : f32
    %6 = vector.broadcast %cst_5 : f32 to vector<8x256xf32>
    %7 = arith.cmpf oge, %5, %6 : vector<8x256xf32>
    %c0_6 = arith.constant 0 : index
    %c0_7 = arith.constant 0 : index
    %8 = vector.load %arg4[%c0_6, %c0_7] : memref<8x1xf32, #tpu.memory_space<vmem>>, vector<8x1xf32>
    %9 = vector.broadcast %8 : vector<8x1xf32> to vector<8x256xf32>
    %10 = arith.mulf %9, %5 : vector<8x256xf32>
    %11 = arith.select %7, %5, %10 : vector<8x256xi1>, vector<8x256xf32>
    %12 = arith.truncf %11 : vector<8x256xf32> to vector<8x256xbf16>
    %c0_8 = arith.constant 0 : index
    %c0_9 = arith.constant 0 : index
    %13 = vector.load %arg5[%c0_8, %c0_9] : memref<8x256xbf16, #tpu.memory_space<vmem>>, vector<8x256xbf16>
    tpu.vector_store %arg5[%c0_8, %c0_9], %12 {strides = array<i32>} : memref<8x256xbf16, #tpu.memory_space<vmem>>, vector<8x256xbf16>,
    return
  }
  func.func @transform_0(%arg0: i32) -> (i32, i32) {
    %c0_i32 = arith.constant 0 : i32
    %c0_i32_0 = arith.constant 0 : i32
    %c0_i32_1 = arith.constant 0 : i32
    return %c0_i32, %c0_i32_0 : i32, i32
  }
  func.func @transform_1(%arg0: i32) -> (i32, i32) {
    %c0_i32 = arith.constant 0 : i32
    %c0_i32_0 = arith.constant 0 : i32
    return %c0_i32, %arg0 : i32, i32
  }
  func.func @transform_2(%arg0: i32) -> (i32, i32) {
    %c0_i32 = arith.constant 0 : i32
    %c0_i32_0 = arith.constant 0 : i32
    %c0_i32_1 = arith.constant 0 : i32
    return %c0_i32, %c0_i32_0 : i32, i32
  }
  func.func @transform_3(%arg0: i32) -> (i32, i32) {
    %c0_i32 = arith.constant 0 : i32
    %c0_i32_0 = arith.constant 0 : i32
    %c0_i32_1 = arith.constant 0 : i32
    return %c0_i32, %c0_i32_0 : i32, i32
  }
  func.func @transform_4(%arg0: i32) -> (i32, i32) {
    %c0_i32 = arith.constant 0 : i32
    %c0_i32_0 = arith.constant 0 : i32
    return %c0_i32, %arg0 : i32, i32
  }
}

module attributes {stable_mosaic.version = 11 : i64} {
  func.func @_wx_bias_prelu_kernel(%arg0: i32, %arg1: memref<8x144xbf16, #tpu.memory_space<vmem>>, %arg2: memref<144x128xbf16, #tpu.memory_space<vmem>>, %arg3: memref<8x1xf32, #tpu.memory_space<vmem>>, %arg4: memref<8x1xf32, #tpu.memory_space<vmem>>, %arg5: memref<8x128xbf16, #tpu.memory_space<vmem>>) attributes {dimension_semantics = [#tpu.dimension_semantics<parallel>], iteration_bounds = array<i64: 1>, scalar_prefetch = 0 : i64, scratch_operands = 0 : i64, tpu.core_type = #tpu.core_type<tc>, window_params = [{pipeline_mode = #tpu.pipeline_mode<synchronous>, transform_indices = @transform_0, window_bounds = array<i64: 8, 144>}, {transform_indices = @transform_1, window_bounds = array<i64: 144, 128>}, {pipeline_mode = #tpu.pipeline_mode<synchronous>, transform_indices = @transform_2, window_bounds = array<i64: 8, 1>}, {pipeline_mode = #tpu.pipeline_mode<synchronous>, transform_indices = @transform_3, window_bounds = array<i64: 8, 1>}, {transform_indices = @transform_4, window_bounds = array<i64: 8, 128>}]} {
    %c0 = arith.constant 0 : index
    %c0_0 = arith.constant 0 : index
    %0 = vector.load %arg1[%c0, %c0_0] : memref<8x144xbf16, #tpu.memory_space<vmem>>, vector<8x144xbf16>
    %c0_1 = arith.constant 0 : index
    %c0_2 = arith.constant 0 : index
    %1 = vector.load %arg2[%c0_1, %c0_2] : memref<144x128xbf16, #tpu.memory_space<vmem>>, vector<144x128xbf16>
    %cst = arith.constant dense<0.000000e+00> : vector<8x128xf32>
    %2 = tpu.matmul %0, %1, %cst {dimension_numbers = #tpu.dot_dimension_numbers<[1], [0], [0], [1], [0, 0, 1, 1], [], []>} : vector<8x144xbf16>, vector<144x128xbf16>, vector<8x128xf32> -> vector<8x128xf32>
    %c0_3 = arith.constant 0 : index
    %c0_4 = arith.constant 0 : index
    %3 = vector.load %arg3[%c0_3, %c0_4] : memref<8x1xf32, #tpu.memory_space<vmem>>, vector<8x1xf32>
    %4 = vector.broadcast %3 : vector<8x1xf32> to vector<8x128xf32>
    %5 = arith.addf %2, %4 : vector<8x128xf32>
    %cst_5 = arith.constant 0.000000e+00 : f32
    %6 = vector.broadcast %cst_5 : f32 to vector<8x128xf32>
    %7 = arith.cmpf oge, %5, %6 : vector<8x128xf32>
    %c0_6 = arith.constant 0 : index
    %c0_7 = arith.constant 0 : index
    %8 = vector.load %arg4[%c0_6, %c0_7] : memref<8x1xf32, #tpu.memory_space<vmem>>, vector<8x1xf32>
    %9 = vector.broadcast %8 : vector<8x1xf32> to vector<8x128xf32>
    %10 = arith.mulf %9, %5 : vector<8x128xf32>
    %11 = arith.select %7, %5, %10 : vector<8x128xi1>, vector<8x128xf32>
    %12 = arith.truncf %11 : vector<8x128xf32> to vector<8x128xbf16>
    %c0_8 = arith.constant 0 : index
    %c0_9 = arith.constant 0 : index
    %13 = vector.load %arg5[%c0_8, %c0_9] : memref<8x128xbf16, #tpu.memory_space<vmem>>, vector<8x128xbf16>
    tpu.vector_store %arg5[%c0_8, %c0_9], %12 {strides = array<i32>} : memref<8x128xbf16, #tpu.memory_space<vmem>>, vector<8x128xbf16>,
    return
  }
  func.func @transform_0(%arg0: i32) -> (i32, i32) {
    %c0_i32 = arith.constant 0 : i32
    %c0_i32_0 = arith.constant 0 : i32
    %c0_i32_1 = arith.constant 0 : i32
    return %c0_i32, %c0_i32_0 : i32, i32
  }
  func.func @transform_1(%arg0: i32) -> (i32, i32) {
    %c0_i32 = arith.constant 0 : i32
    %c0_i32_0 = arith.constant 0 : i32
    return %c0_i32, %arg0 : i32, i32
  }
  func.func @transform_2(%arg0: i32) -> (i32, i32) {
    %c0_i32 = arith.constant 0 : i32
    %c0_i32_0 = arith.constant 0 : i32
    %c0_i32_1 = arith.constant 0 : i32
    return %c0_i32, %c0_i32_0 : i32, i32
  }
  func.func @transform_3(%arg0: i32) -> (i32, i32) {
    %c0_i32 = arith.constant 0 : i32
    %c0_i32_0 = arith.constant 0 : i32
    %c0_i32_1 = arith.constant 0 : i32
    return %c0_i32, %c0_i32_0 : i32, i32
  }
  func.func @transform_4(%arg0: i32) -> (i32, i32) {
    %c0_i32 = arith.constant 0 : i32
    %c0_i32_0 = arith.constant 0 : i32
    return %c0_i32, %arg0 : i32, i32
  }
}

module attributes {stable_mosaic.version = 11 : i64} {
  func.func @_wx_bias_prelu_res_kernel(%arg0: i32, %arg1: memref<16x48xbf16, #tpu.memory_space<vmem>>, %arg2: memref<48x128xbf16, #tpu.memory_space<vmem>>, %arg3: memref<16x1xf32, #tpu.memory_space<vmem>>, %arg4: memref<16x1xf32, #tpu.memory_space<vmem>>, %arg5: memref<16x128xbf16, #tpu.memory_space<vmem>>, %arg6: memref<16x128xbf16, #tpu.memory_space<vmem>>) attributes {dimension_semantics = [#tpu.dimension_semantics<parallel>], iteration_bounds = array<i64: 1>, scalar_prefetch = 0 : i64, scratch_operands = 0 : i64, tpu.core_type = #tpu.core_type<tc>, window_params = [{pipeline_mode = #tpu.pipeline_mode<synchronous>, transform_indices = @transform_0, window_bounds = array<i64: 16, 48>}, {transform_indices = @transform_1, window_bounds = array<i64: 48, 128>}, {pipeline_mode = #tpu.pipeline_mode<synchronous>, transform_indices = @transform_2, window_bounds = array<i64: 16, 1>}, {pipeline_mode = #tpu.pipeline_mode<synchronous>, transform_indices = @transform_3, window_bounds = array<i64: 16, 1>}, {transform_indices = @transform_4, window_bounds = array<i64: 16, 128>}, {transform_indices = @transform_5, window_bounds = array<i64: 16, 128>}]} {
    %c0 = arith.constant 0 : index
    %c0_0 = arith.constant 0 : index
    %0 = vector.load %arg1[%c0, %c0_0] : memref<16x48xbf16, #tpu.memory_space<vmem>>, vector<16x48xbf16>
    %c0_1 = arith.constant 0 : index
    %c0_2 = arith.constant 0 : index
    %1 = vector.load %arg2[%c0_1, %c0_2] : memref<48x128xbf16, #tpu.memory_space<vmem>>, vector<48x128xbf16>
    %cst = arith.constant dense<0.000000e+00> : vector<16x128xf32>
    %2 = tpu.matmul %0, %1, %cst {dimension_numbers = #tpu.dot_dimension_numbers<[1], [0], [0], [1], [0, 0, 1, 1], [], []>} : vector<16x48xbf16>, vector<48x128xbf16>, vector<16x128xf32> -> vector<16x128xf32>
    %c0_3 = arith.constant 0 : index
    %c0_4 = arith.constant 0 : index
    %3 = vector.load %arg3[%c0_3, %c0_4] : memref<16x1xf32, #tpu.memory_space<vmem>>, vector<16x1xf32>
    %4 = vector.broadcast %3 : vector<16x1xf32> to vector<16x128xf32>
    %5 = arith.addf %2, %4 : vector<16x128xf32>
    %cst_5 = arith.constant 0.000000e+00 : f32
    %6 = vector.broadcast %cst_5 : f32 to vector<16x128xf32>
    %7 = arith.cmpf oge, %5, %6 : vector<16x128xf32>
    %c0_6 = arith.constant 0 : index
    %c0_7 = arith.constant 0 : index
    %8 = vector.load %arg4[%c0_6, %c0_7] : memref<16x1xf32, #tpu.memory_space<vmem>>, vector<16x1xf32>
    %9 = vector.broadcast %8 : vector<16x1xf32> to vector<16x128xf32>
    %10 = arith.mulf %9, %5 : vector<16x128xf32>
    %11 = arith.select %7, %5, %10 : vector<16x128xi1>, vector<16x128xf32>
    %c0_8 = arith.constant 0 : index
    %c0_9 = arith.constant 0 : index
    %12 = vector.load %arg5[%c0_8, %c0_9] : memref<16x128xbf16, #tpu.memory_space<vmem>>, vector<16x128xbf16>
    %13 = arith.extf %12 : vector<16x128xbf16> to vector<16x128xf32>
    %14 = arith.subf %11, %13 : vector<16x128xf32>
    %15 = arith.truncf %14 : vector<16x128xf32> to vector<16x128xbf16>
    %c0_10 = arith.constant 0 : index
    %c0_11 = arith.constant 0 : index
    %16 = vector.load %arg6[%c0_10, %c0_11] : memref<16x128xbf16, #tpu.memory_space<vmem>>, vector<16x128xbf16>
    tpu.vector_store %arg6[%c0_10, %c0_11], %15 {strides = array<i32>} : memref<16x128xbf16, #tpu.memory_space<vmem>>, vector<16x128xbf16>,
    return
  }
  func.func @transform_0(%arg0: i32) -> (i32, i32) {
    %c0_i32 = arith.constant 0 : i32
    %c0_i32_0 = arith.constant 0 : i32
    %c0_i32_1 = arith.constant 0 : i32
    return %c0_i32, %c0_i32_0 : i32, i32
  }
  func.func @transform_1(%arg0: i32) -> (i32, i32) {
    %c0_i32 = arith.constant 0 : i32
    %c0_i32_0 = arith.constant 0 : i32
    return %c0_i32, %arg0 : i32, i32
  }
  func.func @transform_2(%arg0: i32) -> (i32, i32) {
    %c0_i32 = arith.constant 0 : i32
    %c0_i32_0 = arith.constant 0 : i32
    %c0_i32_1 = arith.constant 0 : i32
    return %c0_i32, %c0_i32_0 : i32, i32
  }
  func.func @transform_3(%arg0: i32) -> (i32, i32) {
    %c0_i32 = arith.constant 0 : i32
    %c0_i32_0 = arith.constant 0 : i32
    %c0_i32_1 = arith.constant 0 : i32
    return %c0_i32, %c0_i32_0 : i32, i32
  }
  func.func @transform_4(%arg0: i32) -> (i32, i32) {
    %c0_i32 = arith.constant 0 : i32
    %c0_i32_0 = arith.constant 0 : i32
    return %c0_i32, %arg0 : i32, i32
  }
  func.func @transform_5(%arg0: i32) -> (i32, i32) {
    %c0_i32 = arith.constant 0 : i32
    %c0_i32_0 = arith.constant 0 : i32
    return %c0_i32, %arg0 : i32, i32
  }
}

module attributes {stable_mosaic.version = 11 : i64} {
  func.func @_wx_bias_prelu_res_kernel(%arg0: i32, %arg1: memref<8x144xbf16, #tpu.memory_space<vmem>>, %arg2: memref<144x128xbf16, #tpu.memory_space<vmem>>, %arg3: memref<8x1xf32, #tpu.memory_space<vmem>>, %arg4: memref<8x1xf32, #tpu.memory_space<vmem>>, %arg5: memref<8x128xbf16, #tpu.memory_space<vmem>>, %arg6: memref<8x128xf32, #tpu.memory_space<vmem>>) attributes {dimension_semantics = [#tpu.dimension_semantics<parallel>], iteration_bounds = array<i64: 1>, scalar_prefetch = 0 : i64, scratch_operands = 0 : i64, tpu.core_type = #tpu.core_type<tc>, window_params = [{pipeline_mode = #tpu.pipeline_mode<synchronous>, transform_indices = @transform_0, window_bounds = array<i64: 8, 144>}, {transform_indices = @transform_1, window_bounds = array<i64: 144, 128>}, {pipeline_mode = #tpu.pipeline_mode<synchronous>, transform_indices = @transform_2, window_bounds = array<i64: 8, 1>}, {pipeline_mode = #tpu.pipeline_mode<synchronous>, transform_indices = @transform_3, window_bounds = array<i64: 8, 1>}, {transform_indices = @transform_4, window_bounds = array<i64: 8, 128>}, {transform_indices = @transform_5, window_bounds = array<i64: 8, 128>}]} {
    %c0 = arith.constant 0 : index
    %c0_0 = arith.constant 0 : index
    %0 = vector.load %arg1[%c0, %c0_0] : memref<8x144xbf16, #tpu.memory_space<vmem>>, vector<8x144xbf16>
    %c0_1 = arith.constant 0 : index
    %c0_2 = arith.constant 0 : index
    %1 = vector.load %arg2[%c0_1, %c0_2] : memref<144x128xbf16, #tpu.memory_space<vmem>>, vector<144x128xbf16>
    %cst = arith.constant dense<0.000000e+00> : vector<8x128xf32>
    %2 = tpu.matmul %0, %1, %cst {dimension_numbers = #tpu.dot_dimension_numbers<[1], [0], [0], [1], [0, 0, 1, 1], [], []>} : vector<8x144xbf16>, vector<144x128xbf16>, vector<8x128xf32> -> vector<8x128xf32>
    %c0_3 = arith.constant 0 : index
    %c0_4 = arith.constant 0 : index
    %3 = vector.load %arg3[%c0_3, %c0_4] : memref<8x1xf32, #tpu.memory_space<vmem>>, vector<8x1xf32>
    %4 = vector.broadcast %3 : vector<8x1xf32> to vector<8x128xf32>
    %5 = arith.addf %2, %4 : vector<8x128xf32>
    %cst_5 = arith.constant 0.000000e+00 : f32
    %6 = vector.broadcast %cst_5 : f32 to vector<8x128xf32>
    %7 = arith.cmpf oge, %5, %6 : vector<8x128xf32>
    %c0_6 = arith.constant 0 : index
    %c0_7 = arith.constant 0 : index
    %8 = vector.load %arg4[%c0_6, %c0_7] : memref<8x1xf32, #tpu.memory_space<vmem>>, vector<8x1xf32>
    %9 = vector.broadcast %8 : vector<8x1xf32> to vector<8x128xf32>
    %10 = arith.mulf %9, %5 : vector<8x128xf32>
    %11 = arith.select %7, %5, %10 : vector<8x128xi1>, vector<8x128xf32>
    %c0_8 = arith.constant 0 : index
    %c0_9 = arith.constant 0 : index
    %12 = vector.load %arg5[%c0_8, %c0_9] : memref<8x128xbf16, #tpu.memory_space<vmem>>, vector<8x128xbf16>
    %13 = arith.extf %12 : vector<8x128xbf16> to vector<8x128xf32>
    %14 = arith.addf %11, %13 : vector<8x128xf32>
    %c0_10 = arith.constant 0 : index
    %c0_11 = arith.constant 0 : index
    %15 = vector.load %arg6[%c0_10, %c0_11] : memref<8x128xf32, #tpu.memory_space<vmem>>, vector<8x128xf32>
    tpu.vector_store %arg6[%c0_10, %c0_11], %14 {strides = array<i32>} : memref<8x128xf32, #tpu.memory_space<vmem>>, vector<8x128xf32>,
    return
  }
  func.func @transform_0(%arg0: i32) -> (i32, i32) {
    %c0_i32 = arith.constant 0 : i32
    %c0_i32_0 = arith.constant 0 : i32
    %c0_i32_1 = arith.constant 0 : i32
    return %c0_i32, %c0_i32_0 : i32, i32
  }
  func.func @transform_1(%arg0: i32) -> (i32, i32) {
    %c0_i32 = arith.constant 0 : i32
    %c0_i32_0 = arith.constant 0 : i32
    return %c0_i32, %arg0 : i32, i32
  }
  func.func @transform_2(%arg0: i32) -> (i32, i32) {
    %c0_i32 = arith.constant 0 : i32
    %c0_i32_0 = arith.constant 0 : i32
    %c0_i32_1 = arith.constant 0 : i32
    return %c0_i32, %c0_i32_0 : i32, i32
  }
  func.func @transform_3(%arg0: i32) -> (i32, i32) {
    %c0_i32 = arith.constant 0 : i32
    %c0_i32_0 = arith.constant 0 : i32
    %c0_i32_1 = arith.constant 0 : i32
    return %c0_i32, %c0_i32_0 : i32, i32
  }
  func.func @transform_4(%arg0: i32) -> (i32, i32) {
    %c0_i32 = arith.constant 0 : i32
    %c0_i32_0 = arith.constant 0 : i32
    return %c0_i32, %arg0 : i32, i32
  }
  func.func @transform_5(%arg0: i32) -> (i32, i32) {
    %c0_i32 = arith.constant 0 : i32
    %c0_i32_0 = arith.constant 0 : i32
    return %c0_i32, %arg0 : i32, i32
  }
}

</mosaic_0001>

<bundles_post_ra>
// kernel: down_projection_forward.4
= control target key start
LH: loop header
LB: loop body
LE: loop exit
PB: predicated region body
PF: predicated region fallthrough
CT: control target
= control target key end

     0   :  { %s485_s15 = smov 0   ;;  %s487_s16 = smov 0   ;;  %s546_s0 = inlined_call_operand.vmem [shape: bf16[8,16], index: 0, kind: input, shape index: {}]   ;;  %s547_s1 = inlined_call_operand.vmem [shape: bf16[16,512], index: 1, kind: input, shape index: {}]   ;;  %s548_s2 = inlined_call_operand.vmem [shape: f32[8,1], index: 2, kind: input, shape index: {}]   ;;  %s549_s3 = inlined_call_operand.vmem [shape: f32[8,1], index: 3, kind: input, shape index: {}]   ;;  %s550_s4 = inlined_call_operand.vmem [shape: bf16[8,512], index: 4, kind: output, shape index: {}]  }
   0x1   :  { %s489_s17 = smov 0  }
   0x2 LB: > { %s387_s18 = sadd.s32 4294967295, %s457_s17   ;;  %s502_s19 = sadd.s32 1, %s457_s17   ;;  %s457_s17 = sphi %s489_s17, %s553_s17   ;;  %s453_s16 = sphi %s487_s16, %s552_s16   ;;  %s449_s15 = sphi %s485_s15, %s551_s15  }
   0x3   : > { %s39_s20 = ssub.s32 %s457_s17, %s502_s19  ;;  %s42_s21 = sadd.s32 1, %s453_s16 }
   0x4   : > { %p40_p0 = scmp.eq.s32.totalorder %s39_s20, 0  ;;  %p49_p1 = scmp.ne.s32.totalorder %s453_s16, %s449_s15 }
   0x5   : > { %p50_p2 = scmp.eq.s32.totalorder %s457_s17, 0  ;;  %p390_p4 = scmp.ge.s32.totalorder %s457_s17, 2 }
   0x6   : > { %s511_s22 = scalar_select %p40_p0, %s453_s16, %s42_s21  }
   0x7   : > { %p51_p3 = por %p50_p2, %p49_p1  ;;  %152 = sbr.rel (%p390_p4) target bundleno = 21 (0x15), region = 28 }
   0xe   : > { %155 = sbr.rel (!%p51_p3) target bundleno = 21 (0x15), region = 32  ;;  %s157_s23 = sand.u32 (%p51_p3), 1, %s453_s16  }
   0xf   : > { %s404_s24 = sshll.u32 (%p51_p3), %s457_s17, 3  ;;  %s391_s25 = sshll.u32 (%p51_p3), %s157_s23, 4 }
  0x10   : > { %s162_s28 = scalar_lea.vmem (%p51_p3), %s547_s1, %s404_s24  ;;  %s159_s29 = scalar_lea.vmem (%p51_p3), [#allocation2], %s391_s25 }
  0x11   : > { %v192_v0 = vld [vmem:[%s162_s28] sm:$0xff] (%p51_p3)  ;;  %v194_v1 = vld [vmem:[%s162_s28 + $0x10] sm:$0xff] (%p51_p3) }
  0x12   : > { %193 = vst [vmem:[%s159_s29] sm:$0xff] (%p51_p3), %v192_v0  ;;  %195 = vst [vmem:[%s159_s29 + $0x8] sm:$0xff] (%p51_p3), %v194_v1 }
  0x15 PF: > { %p394_p5 = scmp.ge.s32.totalorder %s457_s17, 1  ;;  %p200_p6 = scmp.lt.s32.totalorder %s457_s17, 3 }
  0x17   : > { %p201_p7 = pnand %p394_p5, %p200_p6 }
  0x18   : > { %s207_s30 = sand.u32 (!%p201_p7), 1, %s449_s15   ;;  %v243_v2 = vld [vmem:[%s548_s2] sm:$0xff] (!%p201_p7)  ;;  %v459_v3 = vmov (!%p201_p7), 0   ;;  %vm259_vm0 = vcmask (!%p201_p7), 130048   ;;  %s396_s13 = sshll.u32 (!%p201_p7), %s387_s18, 1 }
  0x19   : > { %204 = sbr.rel (%p201_p7) target bundleno = 253 (0xfd), region = 70  ;;  %s395_s7 = sshll.u32 (!%p201_p7), %s207_s30, 4  ;;  %295 = vmatprep.mubr.bf16.mxu0 (!%p201_p7), %v459_v3  ;;  %431 = vset.pattern.permute.xlu0 (!%p201_p7), %v459_v3  ;;  %v306_v4 = vld [vmem:[%s549_s3] sm:$0xff] (!%p201_p7) }
  0x1a   : > { %246 = vperm.xlu0 (!%p201_p7), %431, %v243_v2   ;;  %s209_s10 = scalar_lea.vmem (!%p201_p7), [#allocation2], %s395_s7  ;;  %v240_v7 = vld [vmem:[%s546_s0] sm:$0xf] (!%p201_p7)  ;;  %p234_p8 = scmp.lt.s32.totalorder (!%p201_p7), %s396_s13, 3 }
  0x1b   : > { %v432_v5 = vld [vmem:[%s209_s10 + $0x4] ss:$8 sps:$4 sm:$0xff] (!%p201_p7)   ;;  %v434_v6 = vld [vmem:[%s209_s10] ss:$8 sps:$4 sm:$0xff] (!%p201_p7)  }
  0x1c   : > { %263 = vmatprep.subr.bf16.mxu0 (!%p201_p7), %v432_v5 }
  0x1d   : > { %264 = vmatpush1.bf16.msra.mxu0 (!%p201_p7), %v434_v6 }
  0x1e   : > { %309 = vperm.xlu0 (!%p201_p7), %431, %v306_v4  }
  0x20   : > { %400 = vmatmul.mubr.msk.bf16.vlgmr.msra.gmra.mrb[0].mxu0 %vm259_vm0, %v240_v7  ;;  %s555_s13 = smov (!%p234_p8, %s396_s13), 3 }
  0x21   : > { %s397_s14 = sshll.u32 %s555_s13, 2 }
  0x22   : > { %s237_s17 = scalar_lea.vmem %s550_s4, %s397_s14 }
  0x99   : > { %v247_v8 = vpop.permute.xlu0 %246 }
  0x9d   : > { %v310_v12 = vpop.permute.xlu0 %309 }
  0xf3   : > { %v297_v9 = vpop.f32.mrb[0].mxu0 }
  0xf4   : > { %v298_v10 = vadd.f32 %v297_v9, %v247_v8  ;;  %v299_v11 = vpop.f32.mrb[1].mxu0 }
  0xf5   : > { %v300_v13 = vadd.f32 %v299_v11, %v247_v8  ;;  %v301_v14 = vpop.f32.mrb[2].mxu0 }
  0xf6   : > { %vm304_vm1 = vcmp.ge.f32.partialorder %v298_v10, 0.0  ;;  %v312_v15 = vmul.f32 %v310_v12, %v298_v10  ;;  %v302_v16 = vpop.f32.mrb[3].mxu0 }
  0xf7   : > { %vm305_vm2 = vcmp.ge.f32.partialorder %v300_v13, 0.0  ;;  %v313_v17 = vmul.f32 %v310_v12, %v300_v13 }
  0xf8   : > { %v314_v18 = vsel %vm304_vm1, %v298_v10, %v312_v15 }
  0xf9   : > { %v315_v19 = vsel %vm305_vm2, %v300_v13, %v313_v17 }
  0xfa   : > { %v405_v20 = vpack.c.bf16 %v315_v19, %v314_v18 }
  0xfc   : > { %324 = vst [vmem:[%s237_s17] sm:$0xff] %v405_v20 }
  0xfd PF: > { %p11_p9 = scmp.ge.s32.totalorder %s502_s19, 4   ;;  %s551_s15 = smov %s453_s16 }
  0xfe   : > { %s552_s16 = smov %s511_s22  ;;  %s553_s17 = smov %s502_s19 }
  0xff   :  { %13 = sbr.rel (!%p11_p9) target bundleno = 2 (0x2), region = 109 }

// kernel: down_projection_forward.5
= control target key start
LH: loop header
LB: loop body
LE: loop exit
PB: predicated region body
PF: predicated region fallthrough
CT: control target
= control target key end

     0   :  { %v187_v0 = vmov 0   ;;  %vm103_vm0 = vcmask 130048   ;;  %s252_s1 = inlined_call_operand.vmem [shape: bf16[144,128], index: 1, kind: input, shape index: {}]   ;;  %s253_s0 = inlined_call_operand.vmem [shape: bf16[8,144], index: 0, kind: input, shape index: {}]   ;;  %s254_s2 = inlined_call_operand.vmem [shape: f32[8,1], index: 2, kind: input, shape index: {}]   ;;  %s255_s3 = inlined_call_operand.vmem [shape: f32[8,1], index: 3, kind: input, shape index: {}]   ;;  %s256_s4 = inlined_call_operand.vmem [shape: bf16[8,128], index: 4, kind: output, shape index: {}]  }
   0x1   :  { %107 = vmatprep.subr.bf16.mxu0 %v187_v0  ;;  %v176_v1 = vld [vmem:[%s252_s1] sm:$0xff]   ;;  %175 = vset.pattern.permute.xlu0 %v187_v0  ;;  %v177_v2 = vld [vmem:[%s252_s1 + $0x8] sm:$0xff]   ;;  %v178_v3 = vld [vmem:[%s252_s1 + $0x10] sm:$0xff]  }
   0x2   :  { %108 = vmatpush1.bf16.msra.mxu0 %v176_v1  ;;  %v18_v4 = vld [vmem:[%s253_s0] sm:$0xff]  ;;  %v179_v6 = vld [vmem:[%s252_s1 + $0x18] sm:$0xff]   ;;  %v181_v10 = vld [vmem:[%s252_s1 + $0x28] sm:$0xff]  }
   0x3   :  { %109 = vmatprep.subr.bf16.mxu0 %v187_v0  ;;  %v37_v5 = vld [vmem:[%s254_s2] sm:$0xff]  ;;  %v163_v7 = vcombine.high %v18_v4, %v18_v4  ;;  %v182_v11 = vld [vmem:[%s252_s1 + $0x30] sm:$0xff]   ;;  %v183_v12 = vld [vmem:[%s252_s1 + $0x38] sm:$0xff]   ;;  %v162_v14 = vcombine.low %v18_v4, %v18_v4 }
   0x4   :  { %40 = vperm.xlu0 %175, %v37_v5   ;;  %v148_v8 = vld [vmem:[%s255_s3] sm:$0xff] }
   0x5   :  { %173 = vmatprep.mubr.msk.bf16.mxu0 %vm103_vm0, %v163_v7  ;;  %v180_v9 = vld [vmem:[%s252_s1 + $0x20] sm:$0xff]  }
   0x6   :  { %110 = vmatpush1.bf16.msra.mxu0 %v177_v2  ;;  %v184_v13 = vld [vmem:[%s252_s1 + $0x40] sm:$0xff]  }
   0x7   :  { %111 = vmatprep.subr.bf16.mxu0 %v187_v0 }
   0x8   :  { %151 = vperm.xlu0 %175, %v148_v8  }
   0xa   :  { %112 = vmatpush1.bf16.msra.mxu0 %v178_v3 }
   0xb   :  { %113 = vmatprep.subr.bf16.mxu0 %v187_v0 }
   0xe   :  { %114 = vmatpush1.bf16.msra.mxu0 %v179_v6 }
   0xf   :  { %115 = vmatprep.subr.bf16.mxu0 %v187_v0 }
  0x12   :  { %116 = vmatpush1.bf16.msra.mxu0 %v180_v9 }
  0x13   :  { %117 = vmatprep.subr.bf16.mxu0 %v187_v0 }
  0x16   :  { %118 = vmatpush1.bf16.msra.mxu0 %v181_v10 }
  0x17   :  { %119 = vmatprep.subr.bf16.mxu0 %v187_v0 }
  0x1a   :  { %120 = vmatpush1.bf16.msra.mxu0 %v182_v11 }
  0x1b   :  { %121 = vmatprep.subr.bf16.mxu0 %v187_v0 }
  0x1e   :  { %122 = vmatpush1.bf16.msra.mxu0 %v183_v12 }
  0x1f   :  { %123 = vmatprep.subr.bf16.mxu0 %v187_v0 }
  0x22   :  { %124 = vmatpush1.bf16.msra.mxu0 %v184_v13 }
  0x25   :  { %140 = vmatmul.mubr.bf16.vlgmr.msra.gmra.mrb[0].mxu0 %v162_v14 }
  0x83   :  { %v41_v15 = vpop.permute.xlu0 %40 }
  0x87   :  { %v152_v19 = vpop.permute.xlu0 %151 }
  0xf8   :  { %v141_v16 = vpop.f32.mrb[0].mxu0 }
  0xf9   :  { %v142_v17 = vadd.f32 %v141_v16, %v41_v15  ;;  %v143_v18 = vpop.f32.mrb[1].mxu0 }
  0xfa   :  { %v144_v20 = vpop.f32.mrb[2].mxu0 }
  0xfb   :  { %vm147_vm1 = vcmp.ge.f32.partialorder %v142_v17, 0.0  ;;  %v154_v21 = vmul.f32 %v152_v19, %v142_v17  ;;  %v145_v22 = vpop.f32.mrb[3].mxu0 }
  0xfd   :  { %v155_v23 = vsel %vm147_vm1, %v142_v17, %v154_v21 }
  0xfe   :  { %v156_v24 = vpack.c.bf16 %v155_v23, %v155_v23 }
 0x100   :  { %157 = vst [vmem:[%s256_s4] sm:$0xf] %v156_v24 }

// kernel: tile.0
= control target key start
LH: loop header
LB: loop body
LE: loop exit
PB: predicated region body
PF: predicated region fallthrough
CT: control target
= control target key end

     0   :  { %s34_s8 = smov 125   ;;  %vm7_vm0 = vcmask 7168   ;;  %s35_s11 = smov 126   ;;  %s61_s0 = inlined_call_operand.vmem [shape: f32[4,4], index: 0, kind: input, shape index: {}]   ;;  %s62_s1 = inlined_call_operand.vmem [shape: f32[16,1], index: 1, kind: output, shape index: {}]  }
   0x1   :  { %v4_v0 = vld [vmem:[%s61_s0] sm:$0xf]  ;;  %s33_s0 = smov 127  }
   0x2   :  { %5 = vst [vmem:[#allocation0] sm:$0xf] %v4_v0 }
   0x9   :  { %v9_v1 = vld [vmem:[#allocation0] sm:$0xf]  }
   0xa   :  { %v21_v2 = vld [vmem:[#allocation0] sm:$0xf]   ;;  %10 = vrot.lane.b32.xlu0 %v9_v1, %s33_s0 }
   0xb   :  { %22 = vrot.lane.b32.xlu1 %v21_v2, %s34_s8  ;;  %v6_v3 = vld [vmem:[#allocation0] sm:$0xf]  }
   0xc   :  { %v15_v4 = vld [vmem:[#allocation0] sm:$0xf]   ;;  %8 = vst.msk [vmem:[%s62_s1] ss:$4 sm:$0xf] %vm7_vm0, %v6_v3  }
   0xe   :  { %16 = vrot.lane.b32.xlu0 %v15_v4, %s35_s11 }
  0x7c   :  { %v11_v5 = vpop.permute.xlu0 %10  }
  0x7d   :  { %v23_v6 = vpop.permute.xlu1 %22   ;;  %27 = vst.msk [vmem:[%s62_s1 + $0x1] ss:$4 sm:$0xf] %vm7_vm0, %v11_v5  }
  0x7e   :  { %29 = vst.msk [vmem:[%s62_s1 + $0x3] ss:$4 sm:$0xf] %vm7_vm0, %v23_v6  }
  0x80   :  { %v17_v7 = vpop.permute.xlu0 %16  }
  0x81   :  { %28 = vst.msk [vmem:[%s62_s1 + $0x2] ss:$4 sm:$0xf] %vm7_vm0, %v17_v7  }

// kernel: tile.13
= control target key start
LH: loop header
LB: loop body
LE: loop exit
PB: predicated region body
PF: predicated region fallthrough
CT: control target
= control target key end

     0   :  { %s22_s0 = inlined_call_operand.vmem [shape: f32[4], index: 0, kind: input, shape index: {}]   ;;  %s23_s1 = inlined_call_operand.vmem [shape: f32[4,4], index: 1, kind: output, shape index: {}]  }
   0x1   :  { %v4_v0 = vld [vmem:[%s22_s0] ss:$0 sm:$0xff] }
   0x2   :  { %5 = vst [vmem:[%s23_s1] sm:$0xf] %v4_v0 }

// kernel: down_projection_forward.6
= control target key start
LH: loop header
LB: loop body
LE: loop exit
PB: predicated region body
PF: predicated region fallthrough
CT: control target
= control target key end

     0   :  { %v188_v0 = vmov 0.0   ;;  %vm189_vm0 = vmmov 0   ;;  %v190_v2 = vmov 0   ;;  %vm64_vm1 = vcmask 392192   ;;  %s251_s1 = inlined_call_operand.vmem [shape: bf16[48,128], index: 1, kind: input, shape index: {}]   ;;  %s252_s2 = inlined_call_operand.vmem [shape: f32[16,1], index: 2, kind: input, shape index: {}]   ;;  %s253_s3 = inlined_call_operand.vmem [shape: f32[16,1], index: 3, kind: input, shape index: {}]   ;;  %s254_s0 = inlined_call_operand.vmem [shape: bf16[16,48], index: 0, kind: input, shape index: {}]   ;;  %s255_s4 = inlined_call_operand.vmem [shape: bf16[16,128], index: 4, kind: input, shape index: {}]   ;;  %s256_s5 = inlined_call_operand.vmem [shape: bf16[16,128], index: 5, kind: output, shape index: {}]  }
   0x1   :  { %169 = vmatprep.subr.bf16.mxu0 %v188_v0  ;;  %v184_v1 = vld [vmem:[%s251_s1] sm:$0xff]   ;;  %175 = vmatprep.mubr.msk.bf16.mxu0 %vm189_vm0, %v188_v0  ;;  %v185_v3 = vld [vmem:[%s251_s1 + $0x8] sm:$0xff]   ;;  %v186_v6 = vld [vmem:[%s251_s1 + $0x10] sm:$0xff]  }
   0x2   :  { %182 = vset.pattern.permute.xlu0 %v190_v2  ;;  %183 = vset.pattern.permute.xlu1 %v190_v2  ;;  %v29_v4 = vld [vmem:[%s252_s2] sm:$0xff]  ;;  %v30_v7 = vld [vmem:[%s252_s2 + $0x8] sm:$0xff] }
   0x3   :  { %170 = vmatpush3.bf16.msra.mxu0 %v184_v1  ;;  %v111_v5 = vld [vmem:[%s253_s3] sm:$0xff]  ;;  %33 = vperm.xlu0 %182, %v29_v4   ;;  %v112_v8 = vld [vmem:[%s253_s3 + $0x8] sm:$0xff] }
   0x4   :  { %171 = vmatprep.subr.bf16.mxu0 %v188_v0  ;;  %115 = vperm.xlu1 %183, %v111_v5   ;;  %v187_v9 = vld [vmem:[%s254_s0] sm:$0xff]  }
   0x5   :  { %v157_v14 = vld [vmem:[%s255_s4] sm:$0xff]  }
   0x6   :  { %v158_v22 = vunpack.c.l.bf16 %v157_v14  ;;  %v159_v23 = vunpack.c.h.bf16 %v157_v14 }
   0x7   :  { %172 = vmatpush3.bf16.msra.mxu0 %v185_v3  ;;  %38 = vperm.xlu0 %182, %v30_v7  }
   0x8   :  { %173 = vmatprep.subr.bf16.mxu0 %v188_v0  ;;  %120 = vperm.xlu1 %183, %v112_v8  }
   0xb   :  { %174 = vmatpush3.bf16.msra.mxu0 %v186_v6 }
   0xe   :  { %176 = vmatmul.mubr.msk.bf16.vlgmr.msra.gmra.mrb[0].mxu0 %vm64_vm1, %v187_v9 }
  0x82   :  { %v34_v10 = vpop.permute.xlu0 %33 }
  0x83   :  { %v116_v11 = vpop.permute.xlu1 %115 }
  0x86   :  { %v39_v16 = vpop.permute.xlu0 %38 }
  0x87   :  { %v121_v21 = vpop.permute.xlu1 %120 }
  0xe1   :  { %v102_v12 = vpop.f32.mrb[0].mxu0 }
  0xe2   :  { %v103_v13 = vadd.f32 %v102_v12, %v34_v10  ;;  %v177_v15 = vpop.f32.mrb[1].mxu0 }
  0xe3   :  { %v105_v17 = vpop.f32.mrb[2].mxu0 }
  0xe4   :  { %vm109_vm2 = vcmp.ge.f32.partialorder %v103_v13, 0.0  ;;  %v123_v18 = vmul.f32 %v116_v11, %v103_v13  ;;  %v106_v19 = vadd.f32 %v105_v17, %v39_v16  ;;  %v178_v20 = vpop.f32.mrb[3].mxu0 }
  0xe6   :  { %v125_v24 = vsel %vm109_vm2, %v103_v13, %v123_v18  ;;  %vm110_vm3 = vcmp.ge.f32.partialorder %v106_v19, 0.0  ;;  %v124_v25 = vmul.f32 %v121_v21, %v106_v19 }
  0xe7   :  { %v131_v27 = vsub.f32 %v125_v24, %v158_v22 }
  0xe8   :  { %v126_v26 = vsel %vm110_vm3, %v106_v19, %v124_v25 }
  0xe9   :  { %v132_v28 = vsub.f32 %v126_v26, %v159_v23 }
  0xeb   :  { %v163_v29 = vpack.c.bf16 %v132_v28, %v131_v27 }
  0xed   :  { %164 = vst [vmem:[%s256_s5] sm:$0xff] %v163_v29  }

// kernel: down_projection_forward.7
= control target key start
LH: loop header
LB: loop body
LE: loop exit
PB: predicated region body
PF: predicated region fallthrough
CT: control target
= control target key end

     0   :  { %v192_v0 = vmov 0   ;;  %vm106_vm0 = vcmask 130048   ;;  %s265_s1 = inlined_call_operand.vmem [shape: bf16[144,128], index: 1, kind: input, shape index: {}]   ;;  %s266_s0 = inlined_call_operand.vmem [shape: bf16[8,144], index: 0, kind: input, shape index: {}]   ;;  %s267_s2 = inlined_call_operand.vmem [shape: f32[8,1], index: 2, kind: input, shape index: {}]   ;;  %s268_s3 = inlined_call_operand.vmem [shape: f32[8,1], index: 3, kind: input, shape index: {}]   ;;  %s269_s4 = inlined_call_operand.vmem [shape: bf16[8,128], index: 4, kind: input, shape index: {}]   ;;  %s270_s5 = inlined_call_operand.vmem [shape: f32[8,128], index: 5, kind: output, shape index: {}]  }
   0x1   :  { %110 = vmatprep.subr.bf16.mxu0 %v192_v0  ;;  %v181_v1 = vld [vmem:[%s265_s1] sm:$0xff]   ;;  %180 = vset.pattern.permute.xlu0 %v192_v0  ;;  %v182_v2 = vld [vmem:[%s265_s1 + $0x8] sm:$0xff]   ;;  %v183_v3 = vld [vmem:[%s265_s1 + $0x10] sm:$0xff]  }
   0x2   :  { %111 = vmatpush1.bf16.msra.mxu0 %v181_v1  ;;  %v21_v4 = vld [vmem:[%s266_s0] sm:$0xff]  ;;  %v184_v6 = vld [vmem:[%s265_s1 + $0x18] sm:$0xff]   ;;  %v186_v10 = vld [vmem:[%s265_s1 + $0x28] sm:$0xff]  }
   0x3   :  { %112 = vmatprep.subr.bf16.mxu0 %v192_v0  ;;  %v40_v5 = vld [vmem:[%s267_s2] sm:$0xff]  ;;  %v168_v7 = vcombine.high %v21_v4, %v21_v4  ;;  %v187_v11 = vld [vmem:[%s265_s1 + $0x30] sm:$0xff]   ;;  %v188_v12 = vld [vmem:[%s265_s1 + $0x38] sm:$0xff]   ;;  %v167_v14 = vcombine.low %v21_v4, %v21_v4 }
   0x4   :  { %43 = vperm.xlu0 %180, %v40_v5   ;;  %v151_v8 = vld [vmem:[%s268_s3] sm:$0xff] }
   0x5   :  { %178 = vmatprep.mubr.msk.bf16.mxu0 %vm106_vm0, %v168_v7  ;;  %v185_v9 = vld [vmem:[%s265_s1 + $0x20] sm:$0xff]  }
   0x6   :  { %113 = vmatpush1.bf16.msra.mxu0 %v182_v2  ;;  %v189_v13 = vld [vmem:[%s265_s1 + $0x40] sm:$0xff]  }
   0x7   :  { %114 = vmatprep.subr.bf16.mxu0 %v192_v0  ;;  %v159_v16 = vld [vmem:[%s269_s4] sm:$0xf] }
   0x8   :  { %154 = vperm.xlu0 %180, %v151_v8   ;;  %v160_v21 = vunpack.c.l.bf16 %v159_v16 }
   0xa   :  { %115 = vmatpush1.bf16.msra.mxu0 %v183_v3 }
   0xb   :  { %116 = vmatprep.subr.bf16.mxu0 %v192_v0 }
   0xe   :  { %117 = vmatpush1.bf16.msra.mxu0 %v184_v6 }
   0xf   :  { %118 = vmatprep.subr.bf16.mxu0 %v192_v0 }
  0x12   :  { %119 = vmatpush1.bf16.msra.mxu0 %v185_v9 }
  0x13   :  { %120 = vmatprep.subr.bf16.mxu0 %v192_v0 }
  0x16   :  { %121 = vmatpush1.bf16.msra.mxu0 %v186_v10 }
  0x17   :  { %122 = vmatprep.subr.bf16.mxu0 %v192_v0 }
  0x1a   :  { %123 = vmatpush1.bf16.msra.mxu0 %v187_v11 }
  0x1b   :  { %124 = vmatprep.subr.bf16.mxu0 %v192_v0 }
  0x1e   :  { %125 = vmatpush1.bf16.msra.mxu0 %v188_v12 }
  0x1f   :  { %126 = vmatprep.subr.bf16.mxu0 %v192_v0 }
  0x22   :  { %127 = vmatpush1.bf16.msra.mxu0 %v189_v13 }
  0x25   :  { %143 = vmatmul.mubr.bf16.vlgmr.msra.gmra.mrb[0].mxu0 %v167_v14 }
  0x83   :  { %v44_v15 = vpop.permute.xlu0 %43 }
  0x87   :  { %v155_v20 = vpop.permute.xlu0 %154 }
  0xf8   :  { %v144_v17 = vpop.f32.mrb[0].mxu0 }
  0xf9   :  { %v145_v18 = vadd.f32 %v144_v17, %v44_v15  ;;  %v146_v19 = vpop.f32.mrb[1].mxu0 }
  0xfa   :  { %v147_v22 = vpop.f32.mrb[2].mxu0 }
  0xfb   :  { %vm150_vm1 = vcmp.ge.f32.partialorder %v145_v18, 0.0  ;;  %v157_v23 = vmul.f32 %v155_v20, %v145_v18  ;;  %v148_v24 = vpop.f32.mrb[3].mxu0 }
  0xfd   :  { %v158_v25 = vsel %vm150_vm1, %v145_v18, %v157_v23 }
  0xfe   :  { %v161_v26 = vadd.f32 %v160_v21, %v158_v25 }
 0x100   :  { %162 = vst [vmem:[%s270_s5] sm:$0xff] %v161_v26 }

</bundles_post_ra>
